<compile_context>
chip_gen: v7x
topology: tpu7x:2x2x1
jax: 0.10.0
libtpu: 0.0.40
codegen_flags: <defaults>
</compile_context>

<pallas_src>
import jax
import jax.numpy as jnp
from jax.experimental import pallas as pl
from jax.experimental.pallas import tpu as pltpu

BN_EPS = 1e-5  # PyTorch BatchNorm2d default


# --------------------------------------------------------------------------
# Pass 1: in-kernel 2x2 AvgPool + per-tile BN statistics
# --------------------------------------------------------------------------
def _pool_stats_kernel(x_ref, xpool_ref, tsum_ref, tm2_ref):
    # x_ref:     (2*th, W, C) f32  -- 2*th consecutive NHWC image rows (th pooled rows)
    # xpool_ref: (th*Wo, C)   bf16 -- pooled pixels, row-major
    # tsum_ref:  (1, 1, C)    f32  -- per-tile per-channel sum over 2*th*W pixels
    # tm2_ref:   (1, 1, C)    f32  -- per-tile per-channel centered sum of squares
    two_th, W, _ = x_ref.shape
    th, Wo = two_th // 2, W // 2

    # Even / odd W columns: strided sublane loads (no HBM relayout; the extra
    # load/XLU work hides under the memory-bound regime).
    ev = x_ref[:, pl.ds(0, Wo, stride=2), :].astype(jnp.float32)   # (2*th, Wo, C)
    od = x_ref[:, pl.ds(1, Wo, stride=2), :].astype(jnp.float32)   # (2*th, Wo, C)
    wsum = ev + od                                                 # (2*th, Wo, C)

    # Even / odd H rows: free leading-dim split, then a VPU add.
    wp = wsum.reshape(th, 2, Wo, wsum.shape[-1])
    pooled = (wp[:, 0] + wp[:, 1]) * 0.25                          # (th, Wo, C)
    xpool_ref[...] = pooled.reshape(xpool_ref.shape).astype(xpool_ref.dtype)

    # Per-tile BN statistics (combined across tiles with Chan's formula in the
    # wrapper -> no E[x^2] - mean^2 cancellation).
    cnt = two_th * W                                               # pixels in this tile
    s = jnp.sum(jnp.sum(wsum, axis=1, keepdims=True),
                axis=0, keepdims=True)                             # (1, 1, C)
    mu = s * (1.0 / cnt)
    d0 = ev - mu
    d1 = od - mu
    m2 = jnp.sum(jnp.sum(d0 * d0 + d1 * d1, axis=1, keepdims=True),
                 axis=0, keepdims=True)                            # (1, 1, C)
    tsum_ref[...] = s
    tm2_ref[...] = m2


# --------------------------------------------------------------------------
# Pass 2: folded (BN + 1x1 conv) on the pooled pixels
# --------------------------------------------------------------------------
def _conv_kernel(xp_ref, w_ref, b_ref, out_ref):
    # xp_ref:  (tp, C)      bf16 pooled pixels
    # w_ref:   (C, Coutp)   bf16 BN-folded 1x1 conv weight (lane-padded if Cout < 128)
    # b_ref:   (1, Coutp)   f32  BN-folded bias
    # out_ref: (tp, Coutp)  f32
    z = jnp.dot(xp_ref[...], w_ref[...], preferred_element_type=jnp.float32)
    out_ref[...] = z + b_ref[...]


# --------------------------------------------------------------------------
# Tile pickers (VMEM budgets include in-kernel temporaries)
# --------------------------------------------------------------------------
def _pick_pool_rows(n_rows, W, C, Wo, max_bytes=6 << 20):
    """Pooled-H-rows per pass-1 tile.

    VMEM per pooled row (double-buffered I/O blocks + in-kernel temporaries):
      in   : 2 * (2*W*C*4)   f32 input block (double-buffered)
      out  : 2 * (Wo*C*2)    bf16 pooled block (double-buffered)
      temps: ~6 * (W*C*4)    ev/od/wsum/d0/d1/products (upper bound)
    6 MiB keeps pass 1 comfortably inside every generation's scoped default.
    """
    per_row = 2 * (2 * W * C * 4) + 2 * (Wo * C * 2) + 6 * (W * C * 4)
    target = max(1, max_bytes // per_row)
    valid = [t for t in range(1, min(target, n_rows) + 1)
             if n_rows % t == 0 and ((t * Wo) % 16 == 0 or t == n_rows)]
    if not valid:
        # Fallback: single whole-array tile (always correct; only hit for
        # awkward factorizations -- may exceed the budget for huge inputs).
        return n_rows
    best = valid[-1]
    even = [t for t in valid if (n_rows // t) % 2 == 0]
    if even and even[-1] * 2 >= best:   # prefer an even tile count (v7x megacore)
        return even[-1]
    return best


def _pick_conv_rows(NP, C, Coutp, max_bytes=8 << 20, target_rows=1024):
    """Pooled-pixel rows per pass-2 tile (decoupled from pass 1)."""
    per_row = 2 * (C * 2) + 2 * (Coutp * 4) + Coutp * 4   # bf16 in, f32 out, f32 acc
    weight_bytes = 2 * (C * Coutp * 2) + Coutp * 4        # double-buffered bf16 w + bias
    budget = max(per_row * 16, max_bytes - weight_bytes)
    target = min(target_rows, max(16, budget // per_row), NP)
    valid = [t for t in range(16, target + 1, 16) if NP % t == 0]
    if not valid:
        return NP
    best = valid[-1]
    even = [t for t in valid if (NP // t) % 2 == 0]
    if even and even[-1] * 2 >= best:
        return even[-1]
    return best


# --------------------------------------------------------------------------
# Wrapper
# --------------------------------------------------------------------------
def transition_layer(x_nchw, gamma, beta, conv_w, *,
                     pool_block_rows=None, conv_block_rows=None):
    """Pallas implementation of TransitionLayer.forward (training-mode BN).

    x_nchw : (N, C, H, W) float32
    gamma  : (C,)  BN weight
    beta   : (C,)  BN bias
    conv_w : (Cout, C, 1, 1)  1x1 conv weight (no bias)
    returns: (N, Cout, H//2, W//2) float32
    """
    N, C, H, W = x_nchw.shape
    Cout = conv_w.shape[0]
    assert H % 2 == 0 and W % 2 == 0, "AvgPool2d(2,2) with odd H/W not supported"
    Ho, Wo = H // 2, W // 2
    n_rows = N * Ho                    # pooled H-rows streamed by pass 1
    NP = N * Ho * Wo                   # pooled pixel count
    NHW = N * H * W

    # NCHW -> NHWC (channels on lanes).  Single remaining wrapper relayout;
    # accepting NHWC at the call site would remove it as well.
    x_rows = jnp.transpose(x_nchw, (0, 2, 3, 1)).reshape(N * H, W, C)

    th = pool_block_rows if pool_block_rows is not None else _pick_pool_rows(n_rows, W, C, Wo)
    assert n_rows % th == 0 and ((th * Wo) % 16 == 0 or th * Wo == NP), (n_rows, th, Wo)
    n1 = n_rows // th

    # ---- pass 1: 2x2 AvgPool + per-tile BN statistics ----------------------
    xpool, tile_sum, tile_m2 = pl.pallas_call(
        _pool_stats_kernel,
        out_shape=(
            jax.ShapeDtypeStruct((NP, C), jnp.bfloat16),
            jax.ShapeDtypeStruct((n1, 1, C), jnp.float32),
            jax.ShapeDtypeStruct((n1, 1, C), jnp.float32),
        ),
        grid=(n1,),
        in_specs=[pl.BlockSpec((2 * th, W, C), lambda i: (i, 0, 0))],
        out_specs=(
            pl.BlockSpec((th * Wo, C), lambda i: (i, 0)),
            pl.BlockSpec((1, 1, C), lambda i: (i, 0, 0)),
            pl.BlockSpec((1, 1, C), lambda i: (i, 0, 0)),
        ),
        compiler_params=pltpu.CompilerParams(
            dimension_semantics=("parallel",)),
    )(x_rows)

    # ---- combine tile stats (Chan's parallel-variance formula) -------------
    cnt_tile = 2 * th * W              # identical for every tile (divisibility)
    tsum = tile_sum.reshape(n1, C)
    tm2 = tile_m2.reshape(n1, C)
    tile_mean = tsum / cnt_tile
    mean = jnp.sum(tsum, axis=0) / NHW                                   # (C,)
    var = (jnp.sum(tm2, axis=0)
           + cnt_tile * jnp.sum((tile_mean - mean) ** 2, axis=0)) / NHW  # biased
    inv_std = jax.lax.rsqrt(var + BN_EPS)

    # ---- fold BN into the 1x1 conv (O(C*Cout), negligible) -----------------
    scale = gamma.astype(jnp.float32) * inv_std                          # (C,)
    shift = beta.astype(jnp.float32) - mean * scale                      # (C,)
    w2d = conv_w.reshape(Cout, C).T.astype(jnp.float32)                  # (C, Cout)
    w_fold = scale[:, None] * w2d                                        # (C, Cout)
    b_fold = shift @ w2d                                                 # (Cout,)

    # Lane-dense pass-2 stores: pad Cout up to 128 when smaller (avoids masked
    # vst.msk partial stores); padded channels are zero and sliced off below.
    Coutp = Cout if Cout >= 128 else 128
    if Coutp != Cout:
        w_fold = jnp.pad(w_fold, ((0, 0), (0, Coutp - Cout)))
        b_fold = jnp.pad(b_fold, ((0, Coutp - Cout),))
    w_fold = w_fold.astype(jnp.bfloat16)     # pre-cast: half the resident weight VMEM
    b_fold = b_fold.reshape(1, Coutp)        # stays f32

    tp2 = conv_block_rows if conv_block_rows is not None else _pick_conv_rows(NP, C, Coutp)
    assert NP % tp2 == 0 and (tp2 % 16 == 0 or tp2 == NP), (NP, tp2)
    n2 = NP // tp2

    # ---- pass 2: pooled pixels @ folded weight + folded bias ---------------
    out2d = pl.pallas_call(
        _conv_kernel,
        out_shape=jax.ShapeDtypeStruct((NP, Coutp), jnp.float32),
        grid=(n2,),
        in_specs=[
            pl.BlockSpec((tp2, C), lambda j: (j, 0)),
            pl.BlockSpec((C, Coutp), lambda j: (0, 0)),
            pl.BlockSpec((1, Coutp), lambda j: (0, 0)),
        ],
        out_specs=pl.BlockSpec((tp2, Coutp), lambda j: (j, 0)),
        compiler_params=pltpu.CompilerParams(
            dimension_semantics=("parallel",)),
    )(xpool, w_fold, b_fold)

    # Back to NCHW to match the PyTorch module.  Returning NHWC directly would
    # save one more XLA relayout pass if the consumer is channels-last.
    out_nhwc = out2d[:, :Cout].reshape(N, Ho, Wo, Cout)
    return jnp.transpose(out_nhwc, (0, 3, 1, 2))


def _reference(x, gamma, beta, conv_w):
    """Pure-JAX reference matching PyTorch semantics (training-mode BN)."""
    N, C, H, W = x.shape
    Cout = conv_w.shape[0]
    mean = x.mean(axis=(0, 2, 3), keepdims=True)
    var = x.var(axis=(0, 2, 3), keepdims=True)        # biased, like PyTorch BN fwd
    xhat = (x - mean) / jnp.sqrt(var + BN_EPS)
    xhat = xhat * gamma[None, :, None, None] + beta[None, :, None, None]
    z = jnp.einsum("nchw,oc->nohw", xhat, conv_w.reshape(Cout, C))
    return z.reshape(N, Cout, H // 2, 2, W // 2, 2).mean(axis=(3, 5))


if __name__ == "__main__":
    # TransitionLayer(in_channels=4, compression_factor=0.5) on a (2,4,16,16) input.
    N, C, H, W = 2, 4, 16, 16
    compression_factor = 0.5
    Cout = int(C * compression_factor)

    key = jax.random.PRNGKey(0)
    kx, kg, kb, kw = jax.random.split(key, 4)
    x = jax.random.normal(kx, (N, C, H, W), jnp.float32)
    gamma = 1.0 + 0.1 * jax.random.normal(kg, (C,), jnp.float32)     # BN weight
    beta = 0.1 * jax.random.normal(kb, (C,), jnp.float32)            # BN bias
    conv_w = jax.random.normal(kw, (Cout, C, 1, 1), jnp.float32) * (1.0 / C)

    # Small explicit tiles so the multi-tile pipelined path and the Chan stats
    # combination are exercised on this toy shape:
    #   pass 1: 16 pooled H-rows / 4 = 4 tiles; pass 2: 128 pixels / 64 = 2 tiles.
    out = transition_layer(x, gamma, beta, conv_w,
                           pool_block_rows=4, conv_block_rows=64)
    out = jax.block_until_ready(out)

    ref = _reference(x, gamma, beta, conv_w)
    assert out.shape == (N, Cout, H // 2, W // 2), out.shape
    # bf16 MXU operands (f32 accumulation) -> loosened tolerance vs the all-f32
    # reference.
    max_err = float(jnp.max(jnp.abs(out - ref)))
    assert jnp.allclose(out, ref, atol=2e-2, rtol=2e-2), max_err

    print("KERNEL_OK")
</pallas_src>

<mosaic_0001>
module attributes {stable_mosaic.version = 11 : i64} {
  func.func @_pool_stats_kernel(%arg0: i32, %arg1: memref<8x16x4xf32, #tpu.memory_space<vmem>>, %arg2: memref<32x4xbf16, #tpu.memory_space<vmem>>, %arg3: memref<1x1x4xf32, #tpu.memory_space<vmem>>, %arg4: memref<1x1x4xf32, #tpu.memory_space<vmem>>) attributes {dimension_semantics = [#tpu.dimension_semantics<parallel>], iteration_bounds = array<i64: 4>, scalar_prefetch = 0 : i64, scratch_operands = 0 : i64, tpu.core_type = #tpu.core_type<tc>, window_params = [{transform_indices = @transform_0, window_bounds = array<i64: 8, 16, 4>}, {transform_indices = @transform_1, window_bounds = array<i64: 32, 4>}, {transform_indices = @transform_2, window_bounds = array<i64: 1, 1, 4>}, {transform_indices = @transform_3, window_bounds = array<i64: 1, 1, 4>}]} {
    %c0 = arith.constant 0 : index
    %c0_0 = arith.constant 0 : index
    %c0_1 = arith.constant 0 : index
    %0 = tpu.strided_load %arg1[%c0, %c0_0, %c0_1] {strides = array<i32: 1, 2, 1>} : memref<8x16x4xf32, #tpu.memory_space<vmem>>, vector<8x8x4xf32>
    %c0_2 = arith.constant 0 : index
    %c1 = arith.constant 1 : index
    %c0_3 = arith.constant 0 : index
    %1 = tpu.strided_load %arg1[%c0_2, %c1, %c0_3] {strides = array<i32: 1, 2, 1>} : memref<8x16x4xf32, #tpu.memory_space<vmem>>, vector<8x8x4xf32>
    %2 = arith.addf %0, %1 : vector<8x8x4xf32>
    %3 = vector.shape_cast %2 : vector<8x8x4xf32> to vector<4x2x8x4xf32>
    %4 = vector.extract_strided_slice %3 {offsets = [0, 0, 0, 0], sizes = [4, 1, 8, 4], strides = [1, 1, 1, 1]} : vector<4x2x8x4xf32> to vector<4x1x8x4xf32>
    %5 = vector.shape_cast %4 : vector<4x1x8x4xf32> to vector<4x8x4xf32>
    %6 = vector.extract_strided_slice %3 {offsets = [0, 1, 0, 0], sizes = [4, 1, 8, 4], strides = [1, 1, 1, 1]} : vector<4x2x8x4xf32> to vector<4x1x8x4xf32>
    %7 = vector.shape_cast %6 : vector<4x1x8x4xf32> to vector<4x8x4xf32>
    %8 = arith.addf %5, %7 : vector<4x8x4xf32>
    %cst = arith.constant 2.500000e-01 : f32
    %9 = vector.broadcast %cst : f32 to vector<4x8x4xf32>
    %10 = arith.mulf %8, %9 : vector<4x8x4xf32>
    %11 = vector.shape_cast %10 : vector<4x8x4xf32> to vector<32x4xf32>
    %12 = arith.truncf %11 : vector<32x4xf32> to vector<32x4xbf16>
    %c0_4 = arith.constant 0 : index
    %c0_5 = arith.constant 0 : index
    %13 = vector.load %arg2[%c0_4, %c0_5] : memref<32x4xbf16, #tpu.memory_space<vmem>>, vector<32x4xbf16>
    tpu.vector_store %arg2[%c0_4, %c0_5], %12 {strides = array<i32>} : memref<32x4xbf16, #tpu.memory_space<vmem>>, vector<32x4xbf16>,
    %cst_6 = arith.constant dense<0.000000e+00> : vector<8x4xf32>
    %14 = vector.multi_reduction <add>, %2, %cst_6 [1] : vector<8x8x4xf32> to vector<8x4xf32>
    %15 = vector.shape_cast %14 : vector<8x4xf32> to vector<8x1x4xf32>
    %cst_7 = arith.constant dense<0.000000e+00> : vector<1x4xf32>
    %16 = vector.multi_reduction <add>, %15, %cst_7 [0] : vector<8x1x4xf32> to vector<1x4xf32>
    %17 = vector.shape_cast %16 : vector<1x4xf32> to vector<1x1x4xf32>
    %cst_8 = arith.constant 7.812500e-03 : f32
    %18 = vector.broadcast %cst_8 : f32 to vector<1x1x4xf32>
    %19 = arith.mulf %17, %18 : vector<1x1x4xf32>
    %20 = vector.broadcast %19 : vector<1x1x4xf32> to vector<8x8x4xf32>
    %21 = arith.subf %0, %20 : vector<8x8x4xf32>
    %22 = vector.broadcast %19 : vector<1x1x4xf32> to vector<8x8x4xf32>
    %23 = arith.subf %1, %22 : vector<8x8x4xf32>
    %24 = arith.mulf %21, %21 : vector<8x8x4xf32>
    %25 = arith.mulf %23, %23 : vector<8x8x4xf32>
    %26 = arith.addf %24, %25 : vector<8x8x4xf32>
    %cst_9 = arith.constant dense<0.000000e+00> : vector<8x4xf32>
    %27 = vector.multi_reduction <add>, %26, %cst_9 [1] : vector<8x8x4xf32> to vector<8x4xf32>
    %28 = vector.shape_cast %27 : vector<8x4xf32> to vector<8x1x4xf32>
    %cst_10 = arith.constant dense<0.000000e+00> : vector<1x4xf32>
    %29 = vector.multi_reduction <add>, %28, %cst_10 [0] : vector<8x1x4xf32> to vector<1x4xf32>
    %30 = vector.shape_cast %29 : vector<1x4xf32> to vector<1x1x4xf32>
    %c0_11 = arith.constant 0 : index
    %c0_12 = arith.constant 0 : index
    %c0_13 = arith.constant 0 : index
    %31 = vector.load %arg3[%c0_11, %c0_12, %c0_13] : memref<1x1x4xf32, #tpu.memory_space<vmem>>, vector<1x1x4xf32>
    tpu.vector_store %arg3[%c0_11, %c0_12, %c0_13], %17 {strides = array<i32>} : memref<1x1x4xf32, #tpu.memory_space<vmem>>, vector<1x1x4xf32>,
    %c0_14 = arith.constant 0 : index
    %c0_15 = arith.constant 0 : index
    %c0_16 = arith.constant 0 : index
    %32 = vector.load %arg4[%c0_14, %c0_15, %c0_16] : memref<1x1x4xf32, #tpu.memory_space<vmem>>, vector<1x1x4xf32>
    tpu.vector_store %arg4[%c0_14, %c0_15, %c0_16], %30 {strides = array<i32>} : memref<1x1x4xf32, #tpu.memory_space<vmem>>, vector<1x1x4xf32>,
    return
  }
  func.func @transform_0(%arg0: i32) -> (i32, i32, i32) {
    %c0_i32 = arith.constant 0 : i32
    %c0_i32_0 = arith.constant 0 : i32
    %c0_i32_1 = arith.constant 0 : i32
    return %arg0, %c0_i32, %c0_i32_0 : i32, i32, i32
  }
  func.func @transform_1(%arg0: i32) -> (i32, i32) {
    %c0_i32 = arith.constant 0 : i32
    %c0_i32_0 = arith.constant 0 : i32
    return %arg0, %c0_i32 : i32, i32
  }
  func.func @transform_2(%arg0: i32) -> (i32, i32, i32) {
    %c0_i32 = arith.constant 0 : i32
    %c0_i32_0 = arith.constant 0 : i32
    %c0_i32_1 = arith.constant 0 : i32
    return %arg0, %c0_i32, %c0_i32_0 : i32, i32, i32
  }
  func.func @transform_3(%arg0: i32) -> (i32, i32, i32) {
    %c0_i32 = arith.constant 0 : i32
    %c0_i32_0 = arith.constant 0 : i32
    %c0_i32_1 = arith.constant 0 : i32
    return %arg0, %c0_i32, %c0_i32_0 : i32, i32, i32
  }
}

</mosaic_0001>

<bundles_post_ra>
// kernel: tpu_custom_call.1
= control target key start
LH: loop header
LB: loop body
LE: loop exit
PB: predicated region body
PF: predicated region fallthrough
CT: control target
= control target key end

     0   :  { %9 = vsyncpa [#allocation3], 0  ;;  %s1082_s0 = inlined_call_operand.vmem [shape: f32[32,16,4], index: 0, kind: input, shape index: {}]   ;;  %s1083_s1 = inlined_call_operand.vmem [shape: bf16[128,4], index: 1, kind: output, shape index: {0}]   ;;  %s1084_s2 = inlined_call_operand.hbm [shape: f32[4,1,4], index: 2, kind: output, shape index: {1}]   ;;  %s1085_s3 = inlined_call_operand.hbm [shape: f32[4,1,4], index: 3, kind: output, shape index: {2}]  }
   0x1   :  { %11 = vsyncpa [#allocation3 + $0x1], 0 }
   0x2   :  { %12 = vsyncpa [#allocation5], 0 }
   0x3   :  { %14 = vsyncpa [#allocation5 + $0x1], 0  ;;  %s797_s12 = smov 0   ;;  %s799_s13 = smov 0  }
   0x4   :  { %s801_s14 = smov 0   ;;  %s803_s15 = smov 0  }
   0x5 LB: > { %s818_s16 = sadd.s32 4294967295, %s773_s15   ;;  %s598_s17 = sadd.s32 4294967294, %s773_s15   ;;  %s773_s15 = sphi %s803_s15, %s1092_s15   ;;  %s769_s14 = sphi %s801_s14, %s1091_s14   ;;  %s765_s13 = sphi %s799_s13, %s1090_s13   ;;  %s761_s12 = sphi %s797_s12, %s1089_s12  }
   0x6   : > { %s822_s18 = sadd.s32 1, %s773_s15   ;;  %s79_s19 = sadd.s32 1, %s769_s14 }
   0x7   : > { %s76_s20 = ssub.s32 %s773_s15, %s822_s18  ;;  %p89_p0 = scmp.ne.s32.totalorder %s769_s14, %s765_s13 }
   0x8   : > { %p77_p1 = scmp.eq.s32.totalorder %s76_s20, 0  ;;  %p90_p2 = scmp.eq.s32.totalorder %s818_s16, 3 }
   0x9   : > { %p95_p3 = scmp.ne.s32.totalorder %s765_s13, %s761_s12  ;;  %p96_p4 = scmp.eq.s32.totalorder %s598_s17, 3 }
   0xa   : > { %s833_s21 = scalar_select %p77_p1, %s769_s14, %s79_s19  }
   0xb   : > { %p835_p5 = por %p90_p2, %p89_p0  ;;  %p839_p6 = por %p96_p4, %p95_p3 }
   0xc   : > { %p601_p7 = scmp.ge.s32.totalorder %s773_s15, 1  ;;  %p150_p8 = scmp.lt.s32.totalorder %s773_s15, 5 }
   0xe   : > { %p151_p9 = pnand %p601_p7, %p150_p8 }
   0xf   : > { %s602_s24 = sshll.u32 (!%p151_p9), %s818_s16, 3  ;;  %vm264_vm0 = vcmask (!%p151_p9), 31744   ;;  %s605_s29 = sshll.u32 (!%p151_p9), %s818_s16, 2  ;;  %vm259_vm1 = vcmask (!%p151_p9), 27648   ;;  %vm448_vm2 = vcmask (!%p151_p9), 24576  }
  0x10   : > { %154 = sbr.rel (%p151_p9) target bundleno = 124 (0x7c), region = 24  ;;  %p184_p10 = scmp.lt.s32.totalorder (!%p151_p9), %s602_s24, 31 }
  0x11   : > { %p932_p11 = scmp.lt.s32.totalorder (!%p151_p9), %s605_s29, 15  ;;  %s949_s5 = sand.u32 (!%p151_p9), 1, %s765_s13  }
  0x12   : > { %s176_s9 = scalar_lea.vmem (!%p151_p9), [#allocation2], %s949_s5  ;;  %s626_s11 = sshll.u32 (!%p151_p9), %s818_s16, 4 }
  0x13   : > { %s477_s10 = sshll.u32 (!%p151_p9), %s176_s9, 4  ;;  %s975_s20 = scalar_lea.hbm (!%p151_p9), %s1084_s2, %s626_s11  ;;  %s968_s10 = int_to_ptr.vmem [resolvable:$true] %s477_s10 }
  0x14   : > { %s775_s26 = smov (!%p151_p9), [#allocation2]  }
  0x15   : > { %s683_s27 = sshll.u32 (!%p151_p9), %s775_s26, 4  ;;  %s684_s27 = int_to_ptr.vmem [resolvable:$false] %s683_s27 }
  0x16   : > { %p686_p1 = scmp.lt.s32.totalorder (!%p151_p9), %s968_s10, %s684_s27 }
  0x17   : > { %s1094_s24 = smov (!%p184_p10, %s602_s24), 31  ;;  %s1096_s29 = smov (!%p932_p11, %s605_s29), 15 }
  0x18   : > { %s630_s25 = sshll.u32 %s1094_s24, 4  ;;  %s606_s4 = sshll.u32 %s1096_s29, 2 }
  0x19   : > { %s188_s28 = scalar_lea.vmem %s1082_s0, %s630_s25  ;;  %s194_s8 = scalar_lea.vmem %s1083_s1, %s606_s4 }
  0x1a   : > { %v849_v0 = vld [vmem:[%s188_s28] ss:$2 sm:$0xff]  ;;  %v851_v1 = vld [vmem:[%s188_s28 + $0x10] ss:$2 sm:$0xff]  ;;  %v865_v8 = vld [vmem:[%s188_s28 + $0x1] ss:$2 sm:$0xff] }
  0x1b   : > { %v853_v2 = vld [vmem:[%s188_s28 + $0x20] ss:$2 sm:$0xff]  ;;  %v855_v3 = vld [vmem:[%s188_s28 + $0x30] ss:$2 sm:$0xff]  ;;  %v867_v9 = vld [vmem:[%s188_s28 + $0x11] ss:$2 sm:$0xff]  ;;  %v875_v12 = vadd.f32 %v865_v8, %v849_v0 }
  0x1c   : > { %v857_v4 = vld [vmem:[%s188_s28 + $0x40] ss:$2 sm:$0xff]  ;;  %v859_v5 = vld [vmem:[%s188_s28 + $0x50] ss:$2 sm:$0xff]  ;;  %v869_v10 = vld [vmem:[%s188_s28 + $0x21] ss:$2 sm:$0xff]  ;;  %v885_v16 = vadd.f32 %v867_v9, %v851_v1 }
  0x1d   : > { %v861_v6 = vld [vmem:[%s188_s28 + $0x60] ss:$2 sm:$0xff]  ;;  %v863_v7 = vld [vmem:[%s188_s28 + $0x70] ss:$2 sm:$0xff]  ;;  %v871_v11 = vld [vmem:[%s188_s28 + $0x31] ss:$2 sm:$0xff]  ;;  %v889_v17 = vadd.f32 %v869_v10, %v853_v2 }
  0x1e   : > { %v877_v13 = vld [vmem:[%s188_s28 + $0x41] ss:$2 sm:$0xff]  ;;  %v879_v14 = vld [vmem:[%s188_s28 + $0x51] ss:$2 sm:$0xff]  ;;  %v893_v18 = vadd.f32 %v871_v11, %v855_v3  ;;  %v265_v23 = vsel %vm264_vm0, %v875_v12, 0.0  ;;  %v272_v26 = vsel %vm264_vm0, %v885_v16, 0.0 }
  0x1f   : > { %v881_v15 = vld [vmem:[%s188_s28 + $0x61] ss:$2 sm:$0xff]  ;;  %v895_v19 = vld [vmem:[%s188_s28 + $0x71] ss:$2 sm:$0xff]  ;;  %v899_v20 = vadd.f32 %v877_v13, %v857_v4  ;;  %v903_v21 = vadd.f32 %v879_v14, %v859_v5  ;;  %v266_v25 = vrot.slane %v265_v23, 4  ;;  %v279_v27 = vsel %vm264_vm0, %v889_v17, 0.0 }
  0x20   : > { %v907_v22 = vadd.f32 %v881_v15, %v861_v6  ;;  %v913_v24 = vadd.f32 %v895_v19, %v863_v7  ;;  %v273_v28 = vrot.slane %v272_v26, 4  ;;  %v280_v29 = vrot.slane %v279_v27, 4  ;;  %s457_s24 = scalar_lea.sflag [#allocation3], %s949_s5  ;;  %s679_s25 = scalar_lea.vmem %s968_s10, 16 }
  0x21   : > { %v286_v30 = vsel %vm264_vm0, %v893_v18, 0.0  ;;  %v293_v31 = vsel %vm264_vm0, %v899_v20, 0.0  ;;  %v267_v32 = vadd.f32 %v266_v25, %v265_v23  ;;  %v300_v35 = vsel %vm264_vm0, %v903_v21, 0.0  ;;  %p680_p12 = scmp.ne.s32.totalorder %s968_s10, %s679_s25  ;;  %s685_s28 = scalar_lea.vmem %s684_s27, 32 }
  0x22   : > { %v287_v33 = vrot.slane %v286_v30, 4  ;;  %v294_v34 = vrot.slane %v293_v31, 4  ;;  %v274_v36 = vadd.f32 %v273_v28, %v272_v26  ;;  %v281_v37 = vadd.f32 %v280_v29, %v279_v27  ;;  %p687_p2 = scmp.lt.s32.totalorder %s685_s28, %s679_s25 }
  0x23   : > { %v301_v38 = vrot.slane %v300_v35, 4  ;;  %v307_v39 = vsel %vm264_vm0, %v907_v22, 0.0  ;;  %v268_v40 = vrot.slane %v267_v32, 2  ;;  %v314_v47 = vsel %vm264_vm0, %v913_v24, 0.0  ;;  %p681_p13 = pnand %p680_p12, %p835_p5 }
  0x24   : > { %v288_v41 = vadd.f32 %v287_v33, %v286_v30  ;;  %v295_v42 = vadd.f32 %v294_v34, %v293_v31  ;;  %v308_v43 = vrot.slane %v307_v39, 4  ;;  %v275_v44 = vrot.slane %v274_v36, 2  ;;  %p688_p3 = por %p687_p2, %p686_p1 }
  0x25   : > { %v282_v45 = vrot.slane %v281_v37, 2  ;;  %v302_v46 = vadd.f32 %v301_v38, %v300_v35  ;;  %v269_v48 = vadd.f32 %v268_v40, %v267_v32  ;;  %v315_v55 = vrot.slane %v314_v47, 4  ;;  %p682_p0 = pneg %p681_p13 }
  0x26   : > { %v289_v49 = vrot.slane %v288_v41, 2  ;;  %v296_v50 = vrot.slane %v295_v42, 2  ;;  %v309_v51 = vadd.f32 %v308_v43, %v307_v39  ;;  %v276_v52 = vadd.f32 %v275_v44, %v274_v36 }
  0x27   : > { %v283_v53 = vadd.f32 %v282_v45, %v281_v37  ;;  %v303_v54 = vrot.slane %v302_v46, 2  ;;  %v270_v56 = vrot.slane %v269_v48, 1  ;;  %v316_v63 = vadd.f32 %v315_v55, %v314_v47  ;;  %p689_p4 = pnand %p688_p3, %p682_p0 }
  0x28   : > { %v290_v57 = vadd.f32 %v289_v49, %v288_v41  ;;  %v297_v58 = vadd.f32 %v296_v50, %v295_v42  ;;  %v310_v59 = vrot.slane %v309_v51, 2  ;;  %v277_v60 = vrot.slane %v276_v52, 1 }
  0x29   : > { %v284_v61 = vrot.slane %v283_v53, 1  ;;  %v304_v62 = vadd.f32 %v303_v54, %v302_v46  ;;  %v271_v23 = vadd.f32 %v270_v56, %v269_v48  ;;  %v317_v31 = vrot.slane %v316_v63, 2 }
  0x2a   : > { %v291_v25 = vrot.slane %v290_v57, 1  ;;  %v298_v26 = vrot.slane %v297_v58, 1  ;;  %v311_v27 = vadd.f32 %v310_v59, %v309_v51  ;;  %v278_v28 = vadd.f32 %v277_v60, %v276_v52 }
  0x2b   : > { %v285_v29 = vadd.f32 %v284_v61, %v283_v53  ;;  %v305_v30 = vrot.slane %v304_v62, 1  ;;  %v321_v34 = vsel %vm264_vm0, %v271_v23, 0.0  ;;  %v318_v36 = vadd.f32 %v317_v31, %v316_v63 }
  0x2c   : > { %v292_v32 = vadd.f32 %v291_v25, %v290_v57  ;;  %v299_v33 = vadd.f32 %v298_v26, %v297_v58  ;;  %v312_v35 = vrot.slane %v311_v27, 1  ;;  %v322_v37 = vsel %vm264_vm0, %v278_v28, 0.0 }
  0x2d   : > { %v324_v38 = vsel %vm264_vm0, %v285_v29, 0.0  ;;  %v306_v39 = vadd.f32 %v305_v30, %v304_v62  ;;  %v323_v40 = vadd.f32 %v322_v37, %v321_v34  ;;  %v319_v41 = vrot.slane %v318_v36, 1 }
  0x2e   : > { %v326_v42 = vsel %vm264_vm0, %v292_v32, 0.0  ;;  %v235_v43 = vadd.f32 %v885_v16, %v875_v12  ;;  %v236_v44 = vadd.f32 %v893_v18, %v889_v17  ;;  %v237_v46 = vadd.f32 %v903_v21, %v899_v20 }
  0x2f   : > { %v325_v45 = vadd.f32 %v324_v38, %v323_v40  ;;  %v238_v47 = vadd.f32 %v913_v24, %v907_v22  ;;  %v313_v48 = vadd.f32 %v312_v35, %v311_v27  ;;  %v328_v49 = vsel %vm264_vm0, %v299_v33, 0.0 }
  0x30   : > { %v239_v50 = vmul.f32 0.25, %v235_v43  ;;  %v240_v51 = vmul.f32 0.25, %v236_v44  ;;  %v241_v12 = vmul.f32 0.25, %v237_v46  ;;  %v320_v17 = vadd.f32 %v319_v41, %v318_v36 }
  0x31   : > { %v327_v52 = vadd.f32 %v326_v42, %v325_v45  ;;  %v242_v16 = vmul.f32 0.25, %v238_v47  ;;  %v330_v18 = vsel %vm264_vm0, %v306_v39, 0.0  ;;  %v332_v54 = vsel %vm264_vm0, %v313_v48, 0.0 }
  0x32   : > { %v631_v20 = vpack.c.bf16 %v239_v50, %v239_v50  ;;  %v632_v21 = vpack.c.bf16 %v240_v51, %v240_v51  ;;  %v633_v24 = vpack.c.bf16 %v241_v12, %v241_v12  ;;  %v334_v56 = vsel %vm264_vm0, %v320_v17, 0.0 }
  0x33   : > { %v329_v22 = vadd.f32 %v328_v49, %v327_v52  ;;  %v634_v53 = vpack.c.bf16 %v242_v16, %v242_v16 }
  0x34   : > { %260 = vst.msk [vmem:[%s194_s8] sm:$0xf] %vm259_vm1, %v631_v20  ;;  %261 = vst.msk [vmem:[%s194_s8 + $0x4] sm:$0xf] %vm259_vm1, %v632_v21 }
  0x35   : > { %v331_v55 = vadd.f32 %v330_v18, %v329_v22  ;;  %262 = vst.msk [vmem:[%s194_s8 + $0x8] sm:$0xf] %vm259_vm1, %v633_v24  ;;  %263 = vst.msk [vmem:[%s194_s8 + $0xc] sm:$0xf] %vm259_vm1, %v634_v53 }
  0x37   : > { %v333_v57 = vadd.f32 %v332_v54, %v331_v55 }
  0x39   : > { %v335_v58 = vadd.f32 %v334_v56, %v333_v57 }
  0x3b   : > { %v336_v59 = vmul.f32 0.0078125, %v335_v58  ;;  %449 = vst.msk [vmem:[%s176_s9] sm:$0x1] %vm448_vm2, %v335_v58 }
  0x3c   : > { %692 = shalt.err (!%p689_p4)
}
  0x3d   : > { %s693_s29 = scalar_lea.hbm %s975_s20, 16  ;;  %s697_s6 = scalar_lea.hbm %s1084_s2, 64 }
  0x3e   : > { %p694_p7 = scmp.ne.s32.totalorder %s975_s20, %s693_s29  ;;  %p698_p10 = scmp.lt.u32.totalorder %s975_s20, %s1084_s2 }
  0x3f   : > { %p699_p11 = scmp.lt.u32.totalorder %s697_s6, %s693_s29  ;;  %p701_p13 = scmp.lt.u32.totalorder %s693_s29, %s975_s20 }
  0x40   : > { %p695_p8 = pnand %p694_p7, %p835_p5 }
  0x41   : > { %p700_p12 = por %p699_p11, %p698_p10 }
  0x42   : > { %p696_p9 = pneg %p695_p8 }
  0x43   : > { %p702_p0 = por %p701_p13, %p700_p12 }
  0x45   : > { %p703_p1 = pnand %p702_p0, %p696_p9 }
  0x47   : > { %706 = shalt.err (!%p703_p1)
}
  0x48   : > { %635 = dma.vmem_to_hbm [thread:$0]  (%p835_p5), %s968_s10, 16, %s975_s20, %s457_s24   ;;  %v337_v60 = vsub.f32 %v849_v0, %v336_v59  ;;  %v338_v61 = vsub.f32 %v851_v1, %v336_v59  ;;  %v339_v62 = vsub.f32 %v853_v2, %v336_v59  ;;  %v340_v63 = vsub.f32 %v855_v3, %v336_v59 }
  0x49   : > { %v341_v23 = vsub.f32 %v857_v4, %v336_v59  ;;  %v342_v25 = vsub.f32 %v859_v5, %v336_v59  ;;  %v343_v26 = vsub.f32 %v861_v6, %v336_v59  ;;  %v344_v27 = vsub.f32 %v863_v7, %v336_v59  ;;  %s182_s9 = scalar_lea.vmem [#allocation4], %s949_s5  ;;  %s1040_s20 = scalar_lea.hbm %s1085_s3, %s626_s11 }
  0x4a   : > { %v345_v28 = vsub.f32 %v865_v8, %v336_v59  ;;  %v346_v29 = vsub.f32 %v867_v9, %v336_v59  ;;  %v347_v0 = vsub.f32 %v869_v10, %v336_v59  ;;  %v348_v1 = vsub.f32 %v871_v11, %v336_v59  ;;  %s490_s10 = sshll.u32 %s182_s9, 4  ;;  %s461_s24 = scalar_lea.sflag [#allocation5], %s949_s5  ;;  %s1033_s10 = int_to_ptr.vmem [resolvable:$true] %s490_s10 }
  0x4b   : > { %v349_v2 = vsub.f32 %v877_v13, %v336_v59  ;;  %v350_v3 = vsub.f32 %v879_v14, %v336_v59  ;;  %v351_v4 = vsub.f32 %v881_v15, %v336_v59  ;;  %v352_v5 = vsub.f32 %v895_v19, %v336_v59  ;;  %s707_s25 = scalar_lea.vmem %s1033_s10, 16  ;;  %s776_s26 = smov [#allocation4]  }
  0x4c   : > { %v353_v30 = vmul.f32 %v337_v60, %v337_v60  ;;  %v354_v6 = vmul.f32 %v338_v61, %v338_v61  ;;  %v355_v31 = vmul.f32 %v339_v62, %v339_v62  ;;  %v356_v7 = vmul.f32 %v340_v63, %v340_v63  ;;  %p708_p2 = scmp.ne.s32.totalorder %s1033_s10, %s707_s25  ;;  %s711_s27 = sshll.u32 %s776_s26, 4  ;;  %s712_s27 = int_to_ptr.vmem [resolvable:$false] %s711_s27 }
  0x4d   : > { %v357_v32 = vmul.f32 %v341_v23, %v341_v23  ;;  %v358_v8 = vmul.f32 %v342_v25, %v342_v25  ;;  %v359_v33 = vmul.f32 %v343_v26, %v343_v26  ;;  %v360_v9 = vmul.f32 %v344_v27, %v344_v27  ;;  %s713_s28 = scalar_lea.vmem %s712_s27, 32  ;;  %p714_p7 = scmp.lt.s32.totalorder %s1033_s10, %s712_s27 }
  0x4e   : > { %v361_v34 = vmul.f32 %v345_v28, %v345_v28  ;;  %v362_v10 = vmul.f32 %v346_v29, %v346_v29  ;;  %v363_v35 = vmul.f32 %v347_v0, %v347_v0  ;;  %v364_v11 = vmul.f32 %v348_v1, %v348_v1  ;;  %p709_p3 = pnand %p708_p2, %p835_p5  ;;  %p715_p8 = scmp.lt.s32.totalorder %s713_s28, %s707_s25 }
  0x4f   : > { %v365_v36 = vmul.f32 %v349_v2, %v349_v2  ;;  %v366_v13 = vmul.f32 %v350_v3, %v350_v3  ;;  %v367_v37 = vmul.f32 %v351_v4, %v351_v4  ;;  %v368_v14 = vmul.f32 %v352_v5, %v352_v5 }
  0x50   : > { %v369_v38 = vadd.f32 %v361_v34, %v353_v30  ;;  %v370_v15 = vadd.f32 %v362_v10, %v354_v6  ;;  %v371_v39 = vadd.f32 %v363_v35, %v355_v31  ;;  %v372_v19 = vadd.f32 %v364_v11, %v356_v7  ;;  %p710_p4 = pneg %p709_p3  ;;  %p716_p9 = por %p715_p8, %p714_p7 }
  0x51   : > { %v373_v40 = vadd.f32 %v365_v36, %v357_v32  ;;  %v374_v41 = vadd.f32 %v366_v13, %v358_v8  ;;  %v375_v42 = vadd.f32 %v367_v37, %v359_v33  ;;  %v376_v43 = vadd.f32 %v368_v14, %v360_v9 }
  0x52   : > { %v377_v44 = vsel %vm264_vm0, %v369_v38, 0.0  ;;  %v384_v45 = vsel %vm264_vm0, %v370_v15, 0.0  ;;  %v391_v46 = vsel %vm264_vm0, %v371_v39, 0.0  ;;  %v398_v47 = vsel %vm264_vm0, %v372_v19, 0.0  ;;  %p717_p10 = pnand %p716_p9, %p710_p4 }
  0x53   : > { %v378_v48 = vrot.slane %v377_v44, 4  ;;  %v385_v49 = vrot.slane %v384_v45, 4  ;;  %v392_v50 = vrot.slane %v391_v46, 4  ;;  %v399_v51 = vrot.slane %v398_v47, 4 }
  0x54   : > { %v405_v52 = vsel %vm264_vm0, %v373_v40, 0.0  ;;  %v412_v12 = vsel %vm264_vm0, %v374_v41, 0.0  ;;  %v419_v16 = vsel %vm264_vm0, %v375_v42, 0.0  ;;  %v426_v17 = vsel %vm264_vm0, %v376_v43, 0.0 }
  0x55   : > { %v379_v18 = vadd.f32 %v378_v48, %v377_v44  ;;  %v386_v20 = vadd.f32 %v385_v49, %v384_v45  ;;  %v393_v21 = vadd.f32 %v392_v50, %v391_v46  ;;  %v400_v22 = vadd.f32 %v399_v51, %v398_v47 }
  0x56   : > { %v406_v24 = vrot.slane %v405_v52, 4  ;;  %v413_v53 = vrot.slane %v412_v12, 4  ;;  %v420_v54 = vrot.slane %v419_v16, 4  ;;  %v427_v55 = vrot.slane %v426_v17, 4 }
  0x57   : > { %v380_v56 = vrot.slane %v379_v18, 2  ;;  %v387_v57 = vrot.slane %v386_v20, 2  ;;  %v394_v58 = vrot.slane %v393_v21, 2  ;;  %v401_v59 = vrot.slane %v400_v22, 2 }
  0x58   : > { %v407_v60 = vadd.f32 %v406_v24, %v405_v52  ;;  %v414_v61 = vadd.f32 %v413_v53, %v412_v12  ;;  %v421_v62 = vadd.f32 %v420_v54, %v419_v16  ;;  %v428_v63 = vadd.f32 %v427_v55, %v426_v17 }
  0x59   : > { %v381_v23 = vadd.f32 %v380_v56, %v379_v18  ;;  %v388_v25 = vadd.f32 %v387_v57, %v386_v20  ;;  %v395_v26 = vadd.f32 %v394_v58, %v393_v21  ;;  %v402_v27 = vadd.f32 %v401_v59, %v400_v22 }
  0x5a   : > { %v408_v28 = vrot.slane %v407_v60, 2  ;;  %v415_v29 = vrot.slane %v414_v61, 2  ;;  %v422_v0 = vrot.slane %v421_v62, 2  ;;  %v429_v1 = vrot.slane %v428_v63, 2 }
  0x5b   : > { %v382_v2 = vrot.slane %v381_v23, 1  ;;  %v389_v3 = vrot.slane %v388_v25, 1  ;;  %v396_v4 = vrot.slane %v395_v26, 1  ;;  %v403_v5 = vrot.slane %v402_v27, 1 }
  0x5c   : > { %v409_v30 = vadd.f32 %v408_v28, %v407_v60  ;;  %v416_v6 = vadd.f32 %v415_v29, %v414_v61  ;;  %v423_v31 = vadd.f32 %v422_v0, %v421_v62  ;;  %v430_v10 = vadd.f32 %v429_v1, %v428_v63 }
  0x5d   : > { %v383_v7 = vadd.f32 %v382_v2, %v381_v23  ;;  %v390_v32 = vadd.f32 %v389_v3, %v388_v25  ;;  %v397_v8 = vadd.f32 %v396_v4, %v395_v26  ;;  %v404_v33 = vadd.f32 %v403_v5, %v402_v27 }
  0x5e   : > { %v410_v9 = vrot.slane %v409_v30, 1  ;;  %v417_v34 = vrot.slane %v416_v6, 1  ;;  %v424_v13 = vrot.slane %v423_v31, 1  ;;  %v431_v15 = vrot.slane %v430_v10, 1 }
  0x5f   : > { %v433_v35 = vsel %vm264_vm0, %v383_v7, 0.0  ;;  %v434_v11 = vsel %vm264_vm0, %v390_v32, 0.0  ;;  %v436_v37 = vsel %vm264_vm0, %v397_v8, 0.0  ;;  %v438_v39 = vsel %vm264_vm0, %v404_v33, 0.0 }
  0x60   : > { %v411_v36 = vadd.f32 %v410_v9, %v409_v30  ;;  %v435_v14 = vadd.f32 %v434_v11, %v433_v35  ;;  %v418_v38 = vadd.f32 %v417_v34, %v416_v6  ;;  %v425_v40 = vadd.f32 %v424_v13, %v423_v31 }
  0x61   : > { %v432_v43 = vadd.f32 %v431_v15, %v430_v10 }
  0x62   : > { %v437_v19 = vadd.f32 %v436_v37, %v435_v14  ;;  %v440_v41 = vsel %vm264_vm0, %v411_v36, 0.0  ;;  %v442_v44 = vsel %vm264_vm0, %v418_v38, 0.0  ;;  %v444_v46 = vsel %vm264_vm0, %v425_v40, 0.0 }
  0x63   : > { %v446_v48 = vsel %vm264_vm0, %v432_v43, 0.0 }
  0x64   : > { %v439_v42 = vadd.f32 %v438_v39, %v437_v19 }
  0x66   : > { %v441_v45 = vadd.f32 %v440_v41, %v439_v42 }
  0x68   : > { %v443_v47 = vadd.f32 %v442_v44, %v441_v45 }
  0x6a   : > { %v445_v49 = vadd.f32 %v444_v46, %v443_v47 }
  0x6c   : > { %v447_v50 = vadd.f32 %v446_v48, %v445_v49 }
  0x6e   : > { %450 = vst.msk [vmem:[%s182_s9] sm:$0x1] %vm448_vm2, %v447_v50 }
  0x6f   : > { %720 = shalt.err (!%p717_p10)
}
  0x70   : > { %s721_s16 = scalar_lea.hbm %s1040_s20, 16  ;;  %s725_s29 = scalar_lea.hbm %s1085_s3, 64 }
  0x71   : > { %p722_p11 = scmp.ne.s32.totalorder %s1040_s20, %s721_s16  ;;  %p726_p0 = scmp.lt.u32.totalorder %s1040_s20, %s1085_s3 }
  0x72   : > { %p727_p1 = scmp.lt.u32.totalorder %s725_s29, %s721_s16  ;;  %p729_p3 = scmp.lt.u32.totalorder %s721_s16, %s1040_s20 }
  0x73   : > { %p723_p12 = pnand %p722_p11, %p835_p5 }
  0x74   : > { %p728_p2 = por %p727_p1, %p726_p0 }
  0x75   : > { %p724_p13 = pneg %p723_p12 }
  0x76   : > { %p730_p4 = por %p729_p3, %p728_p2 }
  0x78   : > { %p731_p7 = pnand %p730_p4, %p724_p13 }
  0x7a   : > { %734 = shalt.err (!%p731_p7)
}
  0x7b   : > { %636 = dma.vmem_to_hbm [thread:$0]  (%p835_p5), %s1033_s10, 16, %s1040_s20, %s461_s24  }
  0x7c PF: > { %p646_p8 = scmp.ge.s32.totalorder %s773_s15, 2  ;;  %s510_s6 = sand.u32 1, %s761_s12  }
  0x7d   : > { %s511_s7 = scalar_lea.sflag [#allocation3], %s510_s6 }
  0x7e   : > { %p640_p9 = pnand %p646_p8, %p839_p6 }
  0x80   : > { %752 = dma.done.wait (!%p640_p9), %s511_s7, 16  }
  0x81   : > { %754 = vsyncadd (!%p640_p9), %s511_s7, 4294967280  ;;  %s519_s8 = scalar_lea.sflag [#allocation5], %s510_s6 }
  0x82   : > { %756 = dma.done.wait (!%p640_p9), %s519_s8, 16  }
  0x83   : > { %758 = vsyncadd (!%p640_p9), %s519_s8, 4294967280  ;;  %p17_p5 = scmp.ge.s32.totalorder %s822_s18, 6   ;;  %s1089_s12 = smov %s765_s13 }
  0x84   : > { %s1090_s13 = smov %s769_s14  ;;  %s1091_s14 = smov %s833_s21 }
  0x85   : > { %s1092_s15 = smov %s822_s18  ;;  %19 = sbr.rel (!%p17_p5) target bundleno = 5 (0x5), region = 103 }
  0x8c   :  { %523 = vsyncpa [#allocation3], 1 }
  0x8d   :  { %525 = vsyncpa [#allocation3 + $0x1], 1 }
  0x8e   :  { %526 = vsyncpa [#allocation5], 1 }
  0x8f   :  { %528 = vsyncpa [#allocation5 + $0x1], 1 }

</bundles_post_ra>
